<compile_context>
chip_gen: v7x
topology: tpu7x:2x2x1
jax: 0.10.0
libtpu: 0.0.40
codegen_flags: <defaults>
</compile_context>

<pallas_src>
import functools

import jax
import jax.numpy as jnp
from jax.experimental import pallas as pl
from jax.experimental.pallas import tpu as pltpu


# ----------------------------------------------------------------------------
# Fused Pallas kernel: per decode step t (sequential grid axis):
#   embedding one-hot matmul -> L x GRU cell -> Linear -> LogSoftmax
# Weights are VMEM-resident across all steps; hidden carried in the resident
# new-hidden output block.
# ----------------------------------------------------------------------------
def _decoder_kernel(tok_ref, emb_ref, h0_ref, wg_ref, bg_ref, wo_ref, bo_ref,
                    logp_ref, hid_ref, xh_ref,
                    *, hidden_size, num_layers, emb_size, d_in_max):
    H = hidden_size
    L = num_layers
    E = emb_size
    d_cat = d_in_max + H
    B = hid_ref.shape[0]            # padded batch
    Vemb = emb_ref.shape[0]         # vocab size (embedding rows)
    cdt = emb_ref.dtype             # matmul input dtype (bf16)

    t = pl.program_id(0)

    # Hidden carry lives in the resident output block; seed it once.
    @pl.when(t == 0)
    def _init():
        hid_ref[...] = h0_ref[...]

    # --- embedding gather: one vector compare -> one-hot @ table on the MXU.
    tok = tok_ref[0]                                               # (B, 1) i32
    onehot = (jax.lax.broadcasted_iota(jnp.int32, (B, Vemb), 1) == tok)
    x = jnp.dot(onehot.astype(cdt), emb_ref[...],
                preferred_element_type=jnp.float32)                # (B, E) f32

    # Packed [x | h] matmul input lives in a persistent VMEM scratch.
    xh_ref[:, 0:E] = x
    if E < d_in_max:
        xh_ref[:, E:d_in_max] = jnp.zeros((B, d_in_max - E), jnp.float32)

    # --- multi-layer GRU: one packed, lane-dense (4H-wide) matmul per layer.
    h_new = None
    for layer in range(L):
        h_prev = hid_ref[:, layer * H:(layer + 1) * H]             # (B, H) f32
        xh_ref[:, d_in_max:d_cat] = h_prev
        g = jnp.dot(xh_ref[...].astype(cdt), wg_ref[layer],
                    preferred_element_type=jnp.float32) + bg_ref[layer]
        # column layout: [ gi_rz + gh_rz | gi_n | gh_n ]
        rz = jax.nn.sigmoid(g[:, 0:2 * H])                         # f32 VPU/EUP
        r = rz[:, 0:H]
        z = rz[:, H:2 * H]
        n = jnp.tanh(g[:, 2 * H:3 * H] + r * g[:, 3 * H:4 * H])
        h_new = (1.0 - z) * n + z * h_prev
        hid_ref[:, layer * H:(layer + 1) * H] = h_new
        if layer + 1 < L:
            xh_ref[:, 0:H] = h_new
            if H < d_in_max:
                xh_ref[:, H:d_in_max] = jnp.zeros((B, d_in_max - H),
                                                  jnp.float32)

    # --- output projection + log-softmax over the vocab (lane) axis.
    logits = jnp.dot(h_new.astype(cdt), wo_ref[...],
                     preferred_element_type=jnp.float32) + bo_ref[...]
    m = jnp.max(logits, axis=1, keepdims=True)
    s = logits - m
    lse = jnp.log(jnp.sum(jnp.exp(s), axis=1, keepdims=True))
    logp_ref[0] = s - lse


# ----------------------------------------------------------------------------
# Jitted driver: one pallas_call over T decode steps (T=1 == module forward).
# ----------------------------------------------------------------------------
@jax.jit
def _run_decoder(packed, tokens, hidden):
    """tokens: (T, B) int32 (teacher forced); hidden: (L, B, H) f32.

    Returns (log_probs (T, B, V), final_hidden (L, B, H)).
    """
    T, B = tokens.shape
    L, _, H = hidden.shape
    Vemb, E = packed["embedding"].shape
    V = packed["w_out_t"].shape[1]
    d_cat = packed["w_gru"].shape[1]
    d_in_max = d_cat - H

    # Pad batch: 8 rows (f32 sublanes) up to 8, multiples of 16 (bf16 packing)
    # beyond that.
    B_pad = 8 if B <= 8 else ((B + 15) // 16) * 16

    toks = jnp.zeros((T, B_pad, 1), jnp.int32).at[:, :B, 0].set(
        tokens.astype(jnp.int32))
    h0 = jnp.zeros((B_pad, L * H), jnp.float32).at[:B, :].set(
        jnp.transpose(hidden.astype(jnp.float32), (1, 0, 2)).reshape(B, L * H))

    kernel = functools.partial(
        _decoder_kernel,
        hidden_size=H, num_layers=L, emb_size=E, d_in_max=d_in_max)

    def nbytes(a):
        return a.size * a.dtype.itemsize

    resident = (nbytes(packed["embedding"]) + nbytes(packed["w_gru"])
                + nbytes(packed["b_gru"]) + nbytes(packed["w_out_t"])
                + nbytes(packed["b_out"]) + 2 * nbytes(h0)
                + 4 * B_pad * V * 4        # double-buffered log-prob blocks
                + 4 * B_pad * 4            # double-buffered token blocks
                + B_pad * d_cat * 4)       # xh scratch
    vmem_limit = int(min(64 << 20, max(8 << 20, 2 * resident + (1 << 20))))

    logp, hid = pl.pallas_call(
        kernel,
        out_shape=(jax.ShapeDtypeStruct((T, B_pad, V), jnp.float32),
                   jax.ShapeDtypeStruct((B_pad, L * H), jnp.float32)),
        grid=(T,),
        in_specs=[
            pl.BlockSpec((1, B_pad, 1), lambda t: (t, 0, 0)),      # tokens
            pl.BlockSpec((Vemb, E), lambda t: (0, 0)),             # embedding
            pl.BlockSpec((B_pad, L * H), lambda t: (0, 0)),        # h0
            pl.BlockSpec((L, d_cat, 4 * H), lambda t: (0, 0, 0)),  # GRU W
            pl.BlockSpec((L, 1, 4 * H), lambda t: (0, 0, 0)),      # GRU b
            pl.BlockSpec((H, V), lambda t: (0, 0)),                # out W
            pl.BlockSpec((1, V), lambda t: (0, 0)),                # out b
        ],
        out_specs=(
            pl.BlockSpec((1, B_pad, V), lambda t: (t, 0, 0)),      # log-probs
            pl.BlockSpec((B_pad, L * H), lambda t: (0, 0)),        # hidden
        ),
        scratch_shapes=[pltpu.VMEM((B_pad, d_cat), jnp.float32)],
        input_output_aliases={2: 1},     # h0 buffer reused for new hidden
        compiler_params=pltpu.CompilerParams(
            dimension_semantics=("arbitrary",),
            vmem_limit_bytes=vmem_limit),
    )(toks, packed["embedding"], h0, packed["w_gru"], packed["b_gru"],
      packed["w_out_t"], packed["b_out"])

    new_hidden = jnp.transpose(hid[:B].reshape(B, L, H), (1, 0, 2))
    return logp[:, :B, :], new_hidden


def decoder_forward(packed, tgt_input, hidden):
    """Module-equivalent forward. tgt_input: (B, 1) int32, hidden: (L, B, H).

    Returns (log_probs (B, V), new_hidden (L, B, H), None, None) — matching
    the PyTorch module's return signature for rnn_type='GRU'.
    """
    tokens = tgt_input.astype(jnp.int32).reshape(-1)[None, :]      # (1, B)
    logp, new_hidden = _run_decoder(packed, tokens, hidden)
    return logp[0], new_hidden, None, None


def decoder_forward_seq(packed, tokens, hidden):
    """Teacher-forced multi-step decode in ONE kernel. tokens: (T, B)."""
    return _run_decoder(packed, tokens, hidden)


# ----------------------------------------------------------------------------
# Parameter packing: fold (W_ih, W_hh, b_ih, b_hh) per layer into one
# (d_in_max + H, 4H) bf16 matrix + (1, 4H) f32 bias.
# ----------------------------------------------------------------------------
def pack_params(raw, dtype=jnp.bfloat16):
    H = raw["gru"][0]["w_hh_t"].shape[0]
    E = raw["embedding"].shape[1]
    d_in_max = max(E, H)
    d_cat = d_in_max + H

    w_packed, b_packed = [], []
    for lw in raw["gru"]:
        w_ih_t = lw["w_ih_t"]            # (d_in, 3H)
        w_hh_t = lw["w_hh_t"]            # (H,    3H)
        d_in = w_ih_t.shape[0]
        W = jnp.zeros((d_cat, 4 * H), jnp.float32)
        # columns [0:2H]   : combined r,z (x rows get W_ih, h rows get W_hh)
        W = W.at[:d_in, 0:2 * H].set(w_ih_t[:, 0:2 * H])
        W = W.at[d_in_max:, 0:2 * H].set(w_hh_t[:, 0:2 * H])
        # columns [2H:3H]  : n-gate input part only
        W = W.at[:d_in, 2 * H:3 * H].set(w_ih_t[:, 2 * H:3 * H])
        # columns [3H:4H]  : n-gate hidden part only
        W = W.at[d_in_max:, 3 * H:4 * H].set(w_hh_t[:, 2 * H:3 * H])
        w_packed.append(W)

        b = jnp.concatenate(
            [lw["b_ih"][:, 0:2 * H] + lw["b_hh"][:, 0:2 * H],
             lw["b_ih"][:, 2 * H:3 * H],
             lw["b_hh"][:, 2 * H:3 * H]], axis=1)                  # (1, 4H)
        b_packed.append(b)

    return dict(
        embedding=raw["embedding"].astype(dtype),                  # (V, E)
        w_gru=jnp.stack(w_packed, 0).astype(dtype),                # (L,d_cat,4H)
        b_gru=jnp.stack(b_packed, 0).astype(jnp.float32),          # (L, 1, 4H)
        w_out_t=raw["w_out_t"].astype(dtype),                      # (H, V)
        b_out=raw["b_out"].astype(jnp.float32),                    # (1, V)
    )


# ----------------------------------------------------------------------------
# Pure-JAX f32 reference (correctness sanity check), single step.
# ----------------------------------------------------------------------------
def decoder_forward_ref(raw, tgt_input, hidden):
    x = raw["embedding"][tgt_input[:, 0]]
    new_hidden = []
    for layer in range(len(raw["gru"])):
        lw = raw["gru"][layer]
        h = hidden[layer]
        H = h.shape[1]
        gi = x @ lw["w_ih_t"] + lw["b_ih"]
        gh = h @ lw["w_hh_t"] + lw["b_hh"]
        r = jax.nn.sigmoid(gi[:, :H] + gh[:, :H])
        z = jax.nn.sigmoid(gi[:, H:2 * H] + gh[:, H:2 * H])
        n = jnp.tanh(gi[:, 2 * H:] + r * gh[:, 2 * H:])
        h_new = (1.0 - z) * n + z * h
        new_hidden.append(h_new)
        x = h_new
    logits = x @ raw["w_out_t"] + raw["b_out"]
    return jax.nn.log_softmax(logits, axis=1), jnp.stack(new_hidden, 0)


# ----------------------------------------------------------------------------
# Deterministic parameter init (PyTorch shapes / init ranges), f32 "raw" form.
# ----------------------------------------------------------------------------
def init_params(key, emb_size, hidden_size, vocab_size, num_layers):
    k_emb, k_gru, k_out = jax.random.split(key, 3)
    params = {}
    # nn.Embedding: N(0, 1)
    params["embedding"] = jax.random.normal(
        k_emb, (vocab_size, emb_size), jnp.float32)

    # nn.GRU: uniform(-1/sqrt(H), 1/sqrt(H)); stored pre-transposed.
    bound = 1.0 / jnp.sqrt(jnp.float32(hidden_size))
    gru_layers = []
    keys = jax.random.split(k_gru, num_layers * 4)
    for layer in range(num_layers):
        d_in = emb_size if layer == 0 else hidden_size
        kw_ih, kw_hh, kb_ih, kb_hh = keys[4 * layer:4 * layer + 4]
        gru_layers.append(dict(
            w_ih_t=jax.random.uniform(kw_ih, (d_in, 3 * hidden_size),
                                      jnp.float32, -bound, bound),
            w_hh_t=jax.random.uniform(kw_hh, (hidden_size, 3 * hidden_size),
                                      jnp.float32, -bound, bound),
            b_ih=jax.random.uniform(kb_ih, (1, 3 * hidden_size),
                                    jnp.float32, -bound, bound),
            b_hh=jax.random.uniform(kb_hh, (1, 3 * hidden_size),
                                    jnp.float32, -bound, bound),
        ))
    params["gru"] = gru_layers

    # nn.Linear(hidden, vocab): uniform(-1/sqrt(hidden), 1/sqrt(hidden))
    kw, kb = jax.random.split(k_out)
    params["w_out_t"] = jax.random.uniform(
        kw, (hidden_size, vocab_size), jnp.float32, -bound, bound)
    params["b_out"] = jax.random.uniform(
        kb, (1, vocab_size), jnp.float32, -bound, bound)
    return params


if __name__ == "__main__":
    emb_size = 32
    hidden_size = 32      # -> 4H = 128: one full lane width per packed matmul
    vocab_size = 128
    num_layers = 2
    batch = 2
    seq_steps = 4

    key = jax.random.PRNGKey(0)
    k_params, k_tok, k_hid, k_seq = jax.random.split(key, 4)

    raw = init_params(k_params, emb_size, hidden_size, vocab_size, num_layers)
    packed = pack_params(raw, dtype=jnp.bfloat16)

    tgt_input = jax.random.randint(k_tok, (batch, 1), 0, vocab_size, jnp.int32)
    hidden = jax.random.normal(k_hid, (num_layers, batch, hidden_size),
                               jnp.float32)

    # --- single-step forward (module semantics) ---------------------------
    log_probs, new_hidden, attn, cell = decoder_forward(packed, tgt_input,
                                                        hidden)
    jax.block_until_ready((log_probs, new_hidden))

    ref_lp, ref_h = decoder_forward_ref(raw, tgt_input, hidden)
    assert log_probs.shape == (batch, vocab_size)
    assert new_hidden.shape == (num_layers, batch, hidden_size)
    assert jnp.allclose(log_probs, ref_lp, atol=3e-2, rtol=3e-2), (
        float(jnp.max(jnp.abs(log_probs - ref_lp))))
    assert jnp.allclose(new_hidden, ref_h, atol=2e-2, rtol=2e-2), (
        float(jnp.max(jnp.abs(new_hidden - ref_h))))

    # --- multi-step teacher-forced decode in ONE kernel call --------------
    tokens_seq = jax.random.randint(k_seq, (seq_steps, batch), 0, vocab_size,
                                    jnp.int32)
    lp_seq, h_seq = decoder_forward_seq(packed, tokens_seq, hidden)
    jax.block_until_ready((lp_seq, h_seq))

    h_ref = hidden
    ref_lps = []
    for t in range(seq_steps):
        lp_t, h_ref = decoder_forward_ref(raw, tokens_seq[t][:, None], h_ref)
        ref_lps.append(lp_t)
    ref_lps = jnp.stack(ref_lps, 0)

    assert lp_seq.shape == (seq_steps, batch, vocab_size)
    assert h_seq.shape == (num_layers, batch, hidden_size)
    assert jnp.allclose(lp_seq, ref_lps, atol=7e-2, rtol=7e-2), (
        float(jnp.max(jnp.abs(lp_seq - ref_lps))))
    assert jnp.allclose(h_seq, h_ref, atol=5e-2, rtol=5e-2), (
        float(jnp.max(jnp.abs(h_seq - h_ref))))

    print("KERNEL_OK")
</pallas_src>

<mosaic_0001>
module attributes {stable_mosaic.version = 11 : i64} {
  func.func @_decoder_kernel(%arg0: i32, %arg1: memref<1x8x1xi32, #tpu.memory_space<vmem>>, %arg2: memref<128x32xbf16, #tpu.memory_space<vmem>>, %arg3: memref<8x64xf32, #tpu.memory_space<vmem>>, %arg4: memref<2x64x128xbf16, #tpu.memory_space<vmem>>, %arg5: memref<2x1x128xf32, #tpu.memory_space<vmem>>, %arg6: memref<32x128xbf16, #tpu.memory_space<vmem>>, %arg7: memref<1x128xf32, #tpu.memory_space<vmem>>, %arg8: memref<1x8x128xf32, #tpu.memory_space<vmem>>, %arg9: memref<8x64xf32, #tpu.memory_space<vmem>>, %arg10: memref<8x64xf32, #tpu.memory_space<vmem>>) attributes {dimension_semantics = [#tpu.dimension_semantics<arbitrary>], iteration_bounds = array<i64: 1>, scalar_prefetch = 0 : i64, scratch_operands = 1 : i64, tpu.core_type = #tpu.core_type<tc>, window_params = [{transform_indices = @transform_0, window_bounds = array<i64: 1, 8, 1>}, {pipeline_mode = #tpu.pipeline_mode<synchronous>, transform_indices = @transform_1, window_bounds = array<i64: 128, 32>}, {pipeline_mode = #tpu.pipeline_mode<synchronous>, transform_indices = @transform_2, window_bounds = array<i64: 8, 64>}, {pipeline_mode = #tpu.pipeline_mode<synchronous>, transform_indices = @transform_3, window_bounds = array<i64: 2, 64, 128>}, {pipeline_mode = #tpu.pipeline_mode<synchronous>, transform_indices = @transform_4, window_bounds = array<i64: 2, 1, 128>}, {pipeline_mode = #tpu.pipeline_mode<synchronous>, transform_indices = @transform_5, window_bounds = array<i64: 32, 128>}, {pipeline_mode = #tpu.pipeline_mode<synchronous>, transform_indices = @transform_6, window_bounds = array<i64: 1, 128>}, {transform_indices = @transform_7, window_bounds = array<i64: 1, 8, 128>}, {pipeline_mode = #tpu.pipeline_mode<synchronous>, transform_indices = @transform_8, window_bounds = array<i64: 8, 64>}]} {
    %c0_i32 = arith.constant 0 : i32
    %0 = arith.cmpi eq, %arg0, %c0_i32 : i32
    %1 = arith.extui %0 : i1 to i32
    %c0_i32_0 = arith.constant 0 : i32
    %2 = arith.cmpi ne, %1, %c0_i32_0 : i32
    scf.if %2 {
      %c0_51 = arith.constant 0 : index
      %c0_52 = arith.constant 0 : index
      %94 = vector.load %arg3[%c0_51, %c0_52] : memref<8x64xf32, #tpu.memory_space<vmem>>, vector<8x64xf32>
      %c0_53 = arith.constant 0 : index
      %c0_54 = arith.constant 0 : index
      %95 = vector.load %arg9[%c0_53, %c0_54] : memref<8x64xf32, #tpu.memory_space<vmem>>, vector<8x64xf32>
      tpu.vector_store %arg9[%c0_53, %c0_54], %94 {strides = array<i32>} : memref<8x64xf32, #tpu.memory_space<vmem>>, vector<8x64xf32>,
    } else {
    }
    %c0 = arith.constant 0 : index
    %c0_1 = arith.constant 0 : index
    %c0_2 = arith.constant 0 : index
    %3 = vector.load %arg1[%c0, %c0_1, %c0_2] : memref<1x8x1xi32, #tpu.memory_space<vmem>>, vector<1x8x1xi32>
    %4 = vector.shape_cast %3 : vector<1x8x1xi32> to vector<8x1xi32>
    %5 = tpu.iota {dimensions = array<i32: 1>} : vector<8x128xi32>
    %6 = vector.broadcast %4 : vector<8x1xi32> to vector<8x128xi32>
    %7 = arith.cmpi eq, %5, %6 : vector<8x128xi32>
    %8 = arith.extui %7 : vector<8x128xi1> to vector<8x128xi32>
    %9 = arith.sitofp %8 : vector<8x128xi32> to vector<8x128xf32>
    %10 = arith.truncf %9 : vector<8x128xf32> to vector<8x128xbf16>
    %c0_3 = arith.constant 0 : index
    %c0_4 = arith.constant 0 : index
    %11 = vector.load %arg2[%c0_3, %c0_4] : memref<128x32xbf16, #tpu.memory_space<vmem>>, vector<128x32xbf16>
    %cst = arith.constant dense<0.000000e+00> : vector<8x32xf32>
    %12 = tpu.matmul %10, %11, %cst {dimension_numbers = #tpu.dot_dimension_numbers<[1], [0], [0], [1], [0, 0, 1, 1], [], []>} : vector<8x128xbf16>, vector<128x32xbf16>, vector<8x32xf32> -> vector<8x32xf32>
    %c0_5 = arith.constant 0 : index
    %c0_6 = arith.constant 0 : index
    %13 = vector.load %arg10[%c0_5, %c0_6] : memref<8x64xf32, #tpu.memory_space<vmem>>, vector<8x32xf32>
    tpu.vector_store %arg10[%c0_5, %c0_6], %12 {strides = array<i32>} : memref<8x64xf32, #tpu.memory_space<vmem>>, vector<8x32xf32>,
    %c0_7 = arith.constant 0 : index
    %c0_8 = arith.constant 0 : index
    %14 = vector.load %arg9[%c0_7, %c0_8] : memref<8x64xf32, #tpu.memory_space<vmem>>, vector<8x32xf32>
    %c0_9 = arith.constant 0 : index
    %c32 = arith.constant 32 : index
    %15 = vector.load %arg10[%c0_9, %c32] : memref<8x64xf32, #tpu.memory_space<vmem>>, vector<8x32xf32>
    tpu.vector_store %arg10[%c0_9, %c32], %14 {strides = array<i32>} : memref<8x64xf32, #tpu.memory_space<vmem>>, vector<8x32xf32>,
    %c0_10 = arith.constant 0 : index
    %c0_11 = arith.constant 0 : index
    %16 = vector.load %arg10[%c0_10, %c0_11] : memref<8x64xf32, #tpu.memory_space<vmem>>, vector<8x64xf32>
    %17 = arith.truncf %16 : vector<8x64xf32> to vector<8x64xbf16>
    %c0_12 = arith.constant 0 : index
    %c0_13 = arith.constant 0 : index
    %c0_14 = arith.constant 0 : index
    %18 = vector.load %arg4[%c0_12, %c0_13, %c0_14] : memref<2x64x128xbf16, #tpu.memory_space<vmem>>, vector<1x64x128xbf16>
    %19 = vector.shape_cast %18 : vector<1x64x128xbf16> to vector<64x128xbf16>
    %cst_15 = arith.constant dense<0.000000e+00> : vector<8x128xf32>
    %20 = tpu.matmul %17, %19, %cst_15 {dimension_numbers = #tpu.dot_dimension_numbers<[1], [0], [0], [1], [0, 0, 1, 1], [], []>} : vector<8x64xbf16>, vector<64x128xbf16>, vector<8x128xf32> -> vector<8x128xf32>
    %c0_16 = arith.constant 0 : index
    %c0_17 = arith.constant 0 : index
    %c0_18 = arith.constant 0 : index
    %21 = vector.load %arg5[%c0_16, %c0_17, %c0_18] : memref<2x1x128xf32, #tpu.memory_space<vmem>>, vector<1x1x128xf32>
    %22 = vector.shape_cast %21 : vector<1x1x128xf32> to vector<1x128xf32>
    %23 = vector.broadcast %22 : vector<1x128xf32> to vector<8x128xf32>
    %24 = arith.addf %20, %23 : vector<8x128xf32>
    %25 = vector.extract_strided_slice %24 {offsets = [0, 0], sizes = [8, 64], strides = [1, 1]} : vector<8x128xf32> to vector<8x64xf32>
    %26 = arith.negf %25 : vector<8x64xf32>
    %27 = math.exp %26 : vector<8x64xf32>
    %cst_19 = arith.constant 1.000000e+00 : f32
    %28 = vector.broadcast %cst_19 : f32 to vector<8x64xf32>
    %29 = arith.addf %28, %27 : vector<8x64xf32>
    %30 = arith.divf %28, %29 : vector<8x64xf32>
    %31 = vector.extract_strided_slice %30 {offsets = [0, 0], sizes = [8, 32], strides = [1, 1]} : vector<8x64xf32> to vector<8x32xf32>
    %32 = vector.extract_strided_slice %30 {offsets = [0, 32], sizes = [8, 32], strides = [1, 1]} : vector<8x64xf32> to vector<8x32xf32>
    %33 = vector.extract_strided_slice %24 {offsets = [0, 64], sizes = [8, 32], strides = [1, 1]} : vector<8x128xf32> to vector<8x32xf32>
    %34 = vector.extract_strided_slice %24 {offsets = [0, 96], sizes = [8, 32], strides = [1, 1]} : vector<8x128xf32> to vector<8x32xf32>
    %35 = arith.mulf %31, %34 : vector<8x32xf32>
    %36 = arith.addf %33, %35 : vector<8x32xf32>
    %37 = math.tanh %36 : vector<8x32xf32>
    %cst_20 = arith.constant 1.000000e+00 : f32
    %38 = vector.broadcast %cst_20 : f32 to vector<8x32xf32>
    %39 = arith.subf %38, %32 : vector<8x32xf32>
    %40 = arith.mulf %39, %37 : vector<8x32xf32>
    %41 = arith.mulf %32, %14 : vector<8x32xf32>
    %42 = arith.addf %40, %41 : vector<8x32xf32>
    %c0_21 = arith.constant 0 : index
    %c0_22 = arith.constant 0 : index
    %43 = vector.load %arg9[%c0_21, %c0_22] : memref<8x64xf32, #tpu.memory_space<vmem>>, vector<8x32xf32>
    tpu.vector_store %arg9[%c0_21, %c0_22], %42 {strides = array<i32>} : memref<8x64xf32, #tpu.memory_space<vmem>>, vector<8x32xf32>,
    %c0_23 = arith.constant 0 : index
    %c0_24 = arith.constant 0 : index
    %44 = vector.load %arg10[%c0_23, %c0_24] : memref<8x64xf32, #tpu.memory_space<vmem>>, vector<8x32xf32>
    tpu.vector_store %arg10[%c0_23, %c0_24], %42 {strides = array<i32>} : memref<8x64xf32, #tpu.memory_space<vmem>>, vector<8x32xf32>,
    %c0_25 = arith.constant 0 : index
    %c32_26 = arith.constant 32 : index
    %45 = vector.load %arg9[%c0_25, %c32_26] : memref<8x64xf32, #tpu.memory_space<vmem>>, vector<8x32xf32>
    %c0_27 = arith.constant 0 : index
    %c32_28 = arith.constant 32 : index
    %46 = vector.load %arg10[%c0_27, %c32_28] : memref<8x64xf32, #tpu.memory_space<vmem>>, vector<8x32xf32>
    tpu.vector_store %arg10[%c0_27, %c32_28], %45 {strides = array<i32>} : memref<8x64xf32, #tpu.memory_space<vmem>>, vector<8x32xf32>,
    %c0_29 = arith.constant 0 : index
    %c0_30 = arith.constant 0 : index
    %47 = vector.load %arg10[%c0_29, %c0_30] : memref<8x64xf32, #tpu.memory_space<vmem>>, vector<8x64xf32>
    %48 = arith.truncf %47 : vector<8x64xf32> to vector<8x64xbf16>
    %c1 = arith.constant 1 : index
    %c0_31 = arith.constant 0 : index
    %c0_32 = arith.constant 0 : index
    %49 = vector.load %arg4[%c1, %c0_31, %c0_32] : memref<2x64x128xbf16, #tpu.memory_space<vmem>>, vector<1x64x128xbf16>
    %50 = vector.shape_cast %49 : vector<1x64x128xbf16> to vector<64x128xbf16>
    %cst_33 = arith.constant dense<0.000000e+00> : vector<8x128xf32>
    %51 = tpu.matmul %48, %50, %cst_33 {dimension_numbers = #tpu.dot_dimension_numbers<[1], [0], [0], [1], [0, 0, 1, 1], [], []>} : vector<8x64xbf16>, vector<64x128xbf16>, vector<8x128xf32> -> vector<8x128xf32>
    %c1_34 = arith.constant 1 : index
    %c0_35 = arith.constant 0 : index
    %c0_36 = arith.constant 0 : index
    %52 = vector.load %arg5[%c1_34, %c0_35, %c0_36] : memref<2x1x128xf32, #tpu.memory_space<vmem>>, vector<1x1x128xf32>
    %53 = vector.shape_cast %52 : vector<1x1x128xf32> to vector<1x128xf32>
    %54 = vector.broadcast %53 : vector<1x128xf32> to vector<8x128xf32>
    %55 = arith.addf %51, %54 : vector<8x128xf32>
    %56 = vector.extract_strided_slice %55 {offsets = [0, 0], sizes = [8, 64], strides = [1, 1]} : vector<8x128xf32> to vector<8x64xf32>
    %57 = arith.negf %56 : vector<8x64xf32>
    %58 = math.exp %57 : vector<8x64xf32>
    %cst_37 = arith.constant 1.000000e+00 : f32
    %59 = vector.broadcast %cst_37 : f32 to vector<8x64xf32>
    %60 = arith.addf %59, %58 : vector<8x64xf32>
    %61 = arith.divf %59, %60 : vector<8x64xf32>
    %62 = vector.extract_strided_slice %61 {offsets = [0, 0], sizes = [8, 32], strides = [1, 1]} : vector<8x64xf32> to vector<8x32xf32>
    %63 = vector.extract_strided_slice %61 {offsets = [0, 32], sizes = [8, 32], strides = [1, 1]} : vector<8x64xf32> to vector<8x32xf32>
    %64 = vector.extract_strided_slice %55 {offsets = [0, 64], sizes = [8, 32], strides = [1, 1]} : vector<8x128xf32> to vector<8x32xf32>
    %65 = vector.extract_strided_slice %55 {offsets = [0, 96], sizes = [8, 32], strides = [1, 1]} : vector<8x128xf32> to vector<8x32xf32>
    %66 = arith.mulf %62, %65 : vector<8x32xf32>
    %67 = arith.addf %64, %66 : vector<8x32xf32>
    %68 = math.tanh %67 : vector<8x32xf32>
    %cst_38 = arith.constant 1.000000e+00 : f32
    %69 = vector.broadcast %cst_38 : f32 to vector<8x32xf32>
    %70 = arith.subf %69, %63 : vector<8x32xf32>
    %71 = arith.mulf %70, %68 : vector<8x32xf32>
    %72 = arith.mulf %63, %45 : vector<8x32xf32>
    %73 = arith.addf %71, %72 : vector<8x32xf32>
    %c0_39 = arith.constant 0 : index
    %c32_40 = arith.constant 32 : index
    %74 = vector.load %arg9[%c0_39, %c32_40] : memref<8x64xf32, #tpu.memory_space<vmem>>, vector<8x32xf32>
    tpu.vector_store %arg9[%c0_39, %c32_40], %73 {strides = array<i32>} : memref<8x64xf32, #tpu.memory_space<vmem>>, vector<8x32xf32>,
    %75 = arith.truncf %73 : vector<8x32xf32> to vector<8x32xbf16>
    %c0_41 = arith.constant 0 : index
    %c0_42 = arith.constant 0 : index
    %76 = vector.load %arg6[%c0_41, %c0_42] : memref<32x128xbf16, #tpu.memory_space<vmem>>, vector<32x128xbf16>
    %cst_43 = arith.constant dense<0.000000e+00> : vector<8x128xf32>
    %77 = tpu.matmul %75, %76, %cst_43 {dimension_numbers = #tpu.dot_dimension_numbers<[1], [0], [0], [1], [0, 0, 1, 1], [], []>} : vector<8x32xbf16>, vector<32x128xbf16>, vector<8x128xf32> -> vector<8x128xf32>
    %c0_44 = arith.constant 0 : index
    %c0_45 = arith.constant 0 : index
    %78 = vector.load %arg7[%c0_44, %c0_45] : memref<1x128xf32, #tpu.memory_space<vmem>>, vector<1x128xf32>
    %79 = vector.broadcast %78 : vector<1x128xf32> to vector<8x128xf32>
    %80 = arith.addf %77, %79 : vector<8x128xf32>
    %cst_46 = arith.constant dense<0xFF800000> : vector<8xf32>
    %81 = vector.multi_reduction <maximumf>, %80, %cst_46 [1] : vector<8x128xf32> to vector<8xf32>
    %82 = vector.shape_cast %81 : vector<8xf32> to vector<8x1xf32>
    %83 = vector.broadcast %82 : vector<8x1xf32> to vector<8x128xf32>
    %84 = arith.subf %80, %83 : vector<8x128xf32>
    %85 = math.exp %84 : vector<8x128xf32>
    %cst_47 = arith.constant dense<0.000000e+00> : vector<8xf32>
    %86 = vector.multi_reduction <add>, %85, %cst_47 [1] : vector<8x128xf32> to vector<8xf32>
    %87 = vector.shape_cast %86 : vector<8xf32> to vector<8x1xf32>
    %88 = math.log %87 : vector<8x1xf32>
    %89 = vector.broadcast %88 : vector<8x1xf32> to vector<8x128xf32>
    %90 = arith.subf %84, %89 : vector<8x128xf32>
    %c0_48 = arith.constant 0 : index
    %c0_49 = arith.constant 0 : index
    %c0_50 = arith.constant 0 : index
    %91 = vector.load %arg8[%c0_48, %c0_49, %c0_50] : memref<1x8x128xf32, #tpu.memory_space<vmem>>, vector<1x8x128xf32>
    %92 = vector.shape_cast %91 : vector<1x8x128xf32> to vector<8x128xf32>
    %93 = vector.shape_cast %90 : vector<8x128xf32> to vector<1x8x128xf32>
    tpu.vector_store %arg8[%c0_48, %c0_49, %c0_50], %93 {strides = array<i32>} : memref<1x8x128xf32, #tpu.memory_space<vmem>>, vector<1x8x128xf32>,
    return
  }
  func.func @transform_0(%arg0: i32) -> (i32, i32, i32) {
    %c0_i32 = arith.constant 0 : i32
    %c0_i32_0 = arith.constant 0 : i32
    %c0_i32_1 = arith.constant 0 : i32
    return %arg0, %c0_i32, %c0_i32_0 : i32, i32, i32
  }
  func.func @transform_1(%arg0: i32) -> (i32, i32) {
    %c0_i32 = arith.constant 0 : i32
    %c0_i32_0 = arith.constant 0 : i32
    %c0_i32_1 = arith.constant 0 : i32
    return %c0_i32, %c0_i32_0 : i32, i32
  }
  func.func @transform_2(%arg0: i32) -> (i32, i32) {
    %c0_i32 = arith.constant 0 : i32
    %c0_i32_0 = arith.constant 0 : i32
    %c0_i32_1 = arith.constant 0 : i32
    return %c0_i32, %c0_i32_0 : i32, i32
  }
  func.func @transform_3(%arg0: i32) -> (i32, i32, i32) {
    %c0_i32 = arith.constant 0 : i32
    %c0_i32_0 = arith.constant 0 : i32
    %c0_i32_1 = arith.constant 0 : i32
    %c0_i32_2 = arith.constant 0 : i32
    return %c0_i32, %c0_i32_0, %c0_i32_1 : i32, i32, i32
  }
  func.func @transform_4(%arg0: i32) -> (i32, i32, i32) {
    %c0_i32 = arith.constant 0 : i32
    %c0_i32_0 = arith.constant 0 : i32
    %c0_i32_1 = arith.constant 0 : i32
    %c0_i32_2 = arith.constant 0 : i32
    return %c0_i32, %c0_i32_0, %c0_i32_1 : i32, i32, i32
  }
  func.func @transform_5(%arg0: i32) -> (i32, i32) {
    %c0_i32 = arith.constant 0 : i32
    %c0_i32_0 = arith.constant 0 : i32
    %c0_i32_1 = arith.constant 0 : i32
    return %c0_i32, %c0_i32_0 : i32, i32
  }
  func.func @transform_6(%arg0: i32) -> (i32, i32) {
    %c0_i32 = arith.constant 0 : i32
    %c0_i32_0 = arith.constant 0 : i32
    %c0_i32_1 = arith.constant 0 : i32
    return %c0_i32, %c0_i32_0 : i32, i32
  }
  func.func @transform_7(%arg0: i32) -> (i32, i32, i32) {
    %c0_i32 = arith.constant 0 : i32
    %c0_i32_0 = arith.constant 0 : i32
    %c0_i32_1 = arith.constant 0 : i32
    return %arg0, %c0_i32, %c0_i32_0 : i32, i32, i32
  }
  func.func @transform_8(%arg0: i32) -> (i32, i32) {
    %c0_i32 = arith.constant 0 : i32
    %c0_i32_0 = arith.constant 0 : i32
    %c0_i32_1 = arith.constant 0 : i32
    return %c0_i32, %c0_i32_0 : i32, i32
  }
}

</mosaic_0001>

<bundles_post_ra>
// kernel: _run_decoder.1
= control target key start
LH: loop header
LB: loop body
LE: loop exit
PB: predicated region body
PF: predicated region fallthrough
CT: control target
= control target key end

     0   :  { %v632_v0 = vmov 0   ;;  %v633_v2 = vmov 0.0   ;;  %vm634_vm0 = vmmov 0   ;;  %vm34_vm1 = vcmask 523264   ;;  %s635_s23 = smov 32   ;;  %s637_s14 = smov 64   ;;  %s816_s0 = inlined_call_operand.vmem [shape: s32[1,8,1], index: 0, kind: input, shape index: {}]   ;;  %s817_s1 = inlined_call_operand.vmem [shape: bf16[128,32], index: 1, kind: input, shape index: {}]   ;;  %s818_s2 = inlined_call_operand.vmem [shape: f32[8,64], index: 2, kind: input, shape index: {}, may-alias: {2,8}]   ;;  %s819_s8 = inlined_call_operand.vmem [shape: f32[8,64], index: 8, kind: output, shape index: {1}, may-alias: {2,8}]   ;;  %s820_s3 = inlined_call_operand.vmem [shape: bf16[2,64,128], index: 3, kind: input, shape index: {}]   ;;  %s821_s4 = inlined_call_operand.vmem [shape: f32[2,1,128], index: 4, kind: input, shape index: {}]   ;;  %s822_s5 = inlined_call_operand.vmem [shape: bf16[32,128], index: 5, kind: input, shape index: {}]   ;;  %s823_s6 = inlined_call_operand.vmem [shape: f32[1,128], index: 6, kind: input, shape index: {}]   ;;  %s824_s7 = inlined_call_operand.vmem [shape: f32[1,8,128], index: 7, kind: output, shape index: {0}]  }
   0x1   :  { %597 = vset.pattern.permute.xlu0 %v632_v0  ;;  %v36_v1 = vld [vmem:[%s816_s0] sm:$0xff]  ;;  %538 = vmatprep.subr.bf16.mxu0 %v633_v2  ;;  %v599_v4 = vld [vmem:[%s817_s1 + $0x8] sm:$0xff]   ;;  %v600_v5 = vld [vmem:[%s817_s1 + $0x10] sm:$0xff]   ;;  %v37_v14 = vlaneseq  ;;  %v636_v17 = vmov 1.0|1.0   ;;  %vm150_vm4 = vcmask 261120  }
   0x2   :  { %40 = vperm.xlu0 %597, %v36_v1   ;;  %v598_v3 = vld [vmem:[%s817_s1] sm:$0xff]   ;;  %558 = vmatprep.subr.bf16.mxu1 %v633_v2  ;;  %v601_v7 = vld [vmem:[%s817_s1 + $0x18] sm:$0xff]   ;;  %v603_v11 = vld [vmem:[%s817_s1 + $0x28] sm:$0xff]   ;;  %vm157_vm5 = vcmask 523520   ;;  %s638_s15 = smov 96  }
   0x3   :  { %539 = vmatpush3.bf16.msra.mxu0 %v598_v3  ;;  %554 = vmatprep.mubr.msk.bf16.mxu0 %vm634_vm0, %v633_v2  ;;  %v33_v6 = vld [vmem:[%s818_s2] sm:$0xff]  ;;  %v604_v12 = vld [vmem:[%s817_s1 + $0x30] sm:$0xff]   ;;  %v605_v13 = vld [vmem:[%s817_s1 + $0x38] sm:$0xff]   ;;  %v38_v15 = vand.u32 127, %v37_v14 }
   0x4   :  { %540 = vmatprep.subr.bf16.mxu0 %v633_v2  ;;  %566 = vmatprep.mubr.msk.bf16.mxu1 %vm634_vm0, %v633_v2  ;;  %35 = vst.msk [vmem:[%s819_s8] sm:$0xff] %vm34_vm1, %v33_v6  ;;  %v606_v8 = vld [vmem:[%s820_s3] sm:$0xff]   ;;  %v607_v18 = vld [vmem:[%s820_s3 + $0x8] sm:$0xff]   ;;  %v608_v19 = vld [vmem:[%s820_s3 + $0x10] sm:$0xff]  }
   0x5   :  { %559 = vmatpush3.bf16.msra.mxu1 %v606_v8  ;;  %v602_v9 = vld [vmem:[%s817_s1 + $0x20] sm:$0xff]   ;;  %v609_v20 = vld [vmem:[%s820_s3 + $0x18] sm:$0xff]   ;;  %v611_v44 = vld [vmem:[%s820_s3 + $0x28] sm:$0xff]  }
   0x6   :  { %560 = vmatprep.subr.bf16.mxu1 %v633_v2  ;;  %v489_v28 = vld [vmem:[%s821_s4] ss:$0 sm:$0xff]  ;;  %v612_v47 = vld [vmem:[%s820_s3 + $0x30] sm:$0xff]   ;;  %v613_v51 = vld [vmem:[%s820_s3 + $0x38] sm:$0xff]  }
   0x7   :  { %541 = vmatpush3.bf16.msra.mxu0 %v599_v4  ;;  %v610_v43 = vld [vmem:[%s820_s3 + $0x20] sm:$0xff]   ;;  %v615_v8 = vld [vmem:[%s822_s5 + $0x8] sm:$0xff]  }
   0x8   :  { %542 = vmatprep.subr.bf16.mxu0 %v633_v2  ;;  %v505_v56 = vld [vmem:[%s821_s4 + $0x1] ss:$0 sm:$0xff] }
   0x9   :  { %561 = vmatpush3.bf16.msra.mxu1 %v607_v18 }
   0xa   :  { %562 = vmatprep.subr.bf16.mxu1 %v633_v2 }
   0xb   :  { %543 = vmatpush3.bf16.msra.mxu0 %v600_v5  ;;  %v152_v10 = vld [vmem:[%s819_s8] sm:$0xff] }
   0xc   :  { %544 = vmatprep.subr.bf16.mxu0 %v633_v2  ;;  %154 = vrot.lane.b32.xlu0 %v152_v10, %s635_s23 }
   0xd   :  { %563 = vmatpush3.bf16.msra.mxu1 %v608_v19 }
   0xe   :  { %564 = vmatprep.subr.bf16.mxu1 %v633_v2 }
   0xf   :  { %545 = vmatpush3.bf16.msra.mxu0 %v601_v7  ;;  %v614_v7 = vld [vmem:[%s822_s5] sm:$0xff]  }
  0x10   :  { %546 = vmatprep.subr.bf16.mxu0 %v633_v2 }
  0x11   :  { %565 = vmatpush3.bf16.msra.mxu1 %v609_v20 }
  0x12   :  { %570 = vmatprep.subr.bf16.mxu1 %v633_v2 }
  0x13   :  { %547 = vmatpush3.bf16.msra.mxu0 %v602_v9 }
  0x14   :  { %548 = vmatprep.subr.bf16.mxu0 %v633_v2 }
  0x17   :  { %549 = vmatpush3.bf16.msra.mxu0 %v603_v11 }
  0x18   :  { %550 = vmatprep.subr.bf16.mxu0 %v633_v2 }
  0x1b   :  { %551 = vmatpush3.bf16.msra.mxu0 %v604_v12 }
  0x1c   :  { %552 = vmatprep.subr.bf16.mxu0 %v633_v2 }
  0x1f   :  { %553 = vmatpush3.bf16.msra.mxu0 %v605_v13 }
  0x20   :  { %582 = vmatprep.subr.bf16.mxu0 %v633_v2 }
  0x81   :  { %v41_v16 = vpop.permute.xlu0 %40 }
  0x82   :  { %vm42_vm2 = vcmp.eq.s32.totalorder %v38_v15, %v41_v16 }
  0x83   :  { %vm487_vm3 = vmpackc.low %vm42_vm2, %vm42_vm2 }
  0x84   :  { %555 = vmatmul.mubr.msk.bf16.vlgmr.msra.gmra.mrb[0].mxu0 %vm487_vm3, %v636_v17 }
  0x85   :  { %586 = vmatprep.mubr.msk.bf16.mxu0 %vm634_vm0, %v633_v2  ;;  %v155_v21 = vpop.permute.xlu0 %154  ;;  %583 = vmatpush3.bf16.msra.mxu0 %v614_v7 }
  0x86   :  { %584 = vmatprep.subr.bf16.mxu0 %v633_v2 }
  0x89   :  { %585 = vmatpush3.bf16.msra.mxu0 %v615_v8 }
 0x157   :  { %v144_v22 = vpop.f32.mrb[0].mxu0 }
 0x158   :  { %151 = vst.msk [vmem:[#allocation2] sm:$0xff] %vm150_vm4, %v144_v22  ;;  %v556_v23 = vpop.f32.mrb[1].mxu0 }
 0x159   :  { %158 = vst.msk [vmem:[#allocation2] sm:$0xff] %vm157_vm5, %v155_v21  ;;  %v147_v24 = vpop.f32.mrb[2].mxu0 }
 0x15a   :  { %v557_v25 = vpop.f32.mrb[3].mxu0 }
 0x160   :  { %v159_v26 = vld [vmem:[#allocation2] sm:$0xff] }
 0x161   :  { %v160_v27 = vpack.c.bf16 %v159_v26, %v159_v26 }
 0x163   :  { %567 = vmatmul.mubr.msk.bf16.vlgmr.msra.gmra.mrb[0].mxu1 %vm34_vm1, %v160_v27 }
 0x164   :  { %578 = vmatprep.mubr.msk.bf16.mxu1 %vm634_vm0, %v633_v2  ;;  %571 = vmatpush3.bf16.msra.mxu1 %v610_v43 }
 0x165   :  { %572 = vmatprep.subr.bf16.mxu1 %v633_v2 }
 0x168   :  { %573 = vmatpush3.bf16.msra.mxu1 %v611_v44 }
 0x169   :  { %574 = vmatprep.subr.bf16.mxu1 %v633_v2 }
 0x16c   :  { %575 = vmatpush3.bf16.msra.mxu1 %v612_v47 }
 0x16d   :  { %576 = vmatprep.subr.bf16.mxu1 %v633_v2  ;;  %v512_v2 = vld [vmem:[%s823_s6] ss:$0 sm:$0xff] }
 0x170   :  { %577 = vmatpush3.bf16.msra.mxu1 %v613_v51 }
 0x236   :  { %v238_v29 = vpop.f32.mrb[0].mxu1 }
 0x237   :  { %v239_v30 = vadd.f32 %v489_v28, %v238_v29  ;;  %v568_v31 = vpop.f32.mrb[1].mxu1 }
 0x238   :  { %v241_v32 = vpop.f32.mrb[2].mxu1 }
 0x239   :  { %251 = vrot.lane.b32.xlu1 %v239_v30, %s635_s23  ;;  %v569_v33 = vpop.f32.mrb[3].mxu1  ;;  %v495_v34 = vmul.f32 -1.442695, %v239_v30 }
 0x23b   :  { %616 = vpow2.f32 %v495_v34 }
 0x245   :  { %v617_v35 = vpop.eup %616 }
 0x246   :  { %v247_v36 = vadd.f32 1.0, %v617_v35 }
 0x248   :  { %618 = vrcp.f32 %v247_v36 }
 0x252   :  { %v619_v37 = vpop.eup %618 }
 0x253   :  { %v261_v45 = vsub.f32 1.0, %v619_v37  ;;  %v267_v48 = vmul.f32 %v619_v37, %v155_v21 }
 0x2ab   :  { %v252_v38 = vpop.permute.xlu1 %251 }
 0x2ac   :  { %v254_v39 = vmul.f32 %v619_v37, %v252_v38 }
 0x2ae   :  { %256 = vrot.lane.b32.xlu1 %v254_v39, %s637_s14 }
 0x320   :  { %v257_v40 = vpop.permute.xlu1 %256 }
 0x321   :  { %v259_v41 = vadd.f32 %v257_v40, %v239_v30 }
 0x323   :  { %620 = vtanh.f32 %v259_v41 }
 0x32d   :  { %v621_v42 = vpop.eup %620 }
 0x32e   :  { %263 = vrot.lane.b32.xlu0 %v621_v42, %s638_s15 }
 0x3a0   :  { %v264_v46 = vpop.permute.xlu0 %263 }
 0x3a1   :  { %v266_v49 = vmul.f32 %v264_v46, %v261_v45 }
 0x3a3   :  { %v268_v50 = vadd.f32 %v267_v48, %v266_v49 }
 0x3a5   :  { %270 = vrot.lane.b32.xlu1 %v268_v50, %s638_s15 }
 0x417   :  { %v271_v52 = vpop.permute.xlu1 %270 }
 0x418   :  { %273 = vst.msk [vmem:[%s819_s8] sm:$0xff] %vm150_vm4, %v271_v52  ;;  %274 = vst.msk [vmem:[#allocation2] sm:$0xff] %vm150_vm4, %v271_v52 }
 0x41f   :  { %v275_v53 = vld [vmem:[%s819_s8] sm:$0xff] }
 0x420   :  { %276 = vst.msk [vmem:[#allocation2] sm:$0xff] %vm157_vm5, %v275_v53 }
 0x427   :  { %v277_v54 = vld [vmem:[#allocation2] sm:$0xff] }
 0x428   :  { %v278_v55 = vpack.c.bf16 %v277_v54, %v277_v54 }
 0x42a   :  { %579 = vmatmul.mubr.msk.bf16.vlgmr.msra.gmra.mrb[4].mxu1 %vm34_vm1, %v278_v55 }
 0x4fd   :  { %v357_v57 = vpop.f32.mrb[4].mxu1 }
 0x4fe   :  { %v358_v58 = vadd.f32 %v505_v56, %v357_v57  ;;  %v580_v59 = vpop.f32.mrb[5].mxu1 }
 0x4ff   :  { %v360_v60 = vpop.f32.mrb[6].mxu1 }
 0x500   :  { %370 = vrot.lane.b32.xlu0 %v358_v58, %s635_s23  ;;  %v581_v61 = vpop.f32.mrb[7].mxu1  ;;  %v511_v62 = vmul.f32 -1.442695, %v358_v58 }
 0x502   :  { %622 = vpow2.f32 %v511_v62 }
 0x50c   :  { %v623_v63 = vpop.eup %622 }
 0x50d   :  { %v366_v0 = vadd.f32 1.0, %v623_v63 }
 0x50f   :  { %624 = vrcp.f32 %v366_v0 }
 0x519   :  { %v625_v1 = vpop.eup %624 }
 0x51a   :  { %v380_v10 = vsub.f32 1.0, %v625_v1  ;;  %v386_v12 = vmul.f32 %v625_v1, %v275_v53 }
 0x572   :  { %v371_v3 = vpop.permute.xlu0 %370 }
 0x573   :  { %v373_v4 = vmul.f32 %v625_v1, %v371_v3 }
 0x575   :  { %375 = vrot.lane.b32.xlu1 %v373_v4, %s637_s14 }
 0x5e7   :  { %v376_v5 = vpop.permute.xlu1 %375 }
 0x5e8   :  { %v378_v6 = vadd.f32 %v376_v5, %v358_v58 }
 0x5ea   :  { %626 = vtanh.f32 %v378_v6 }
 0x5f4   :  { %v627_v9 = vpop.eup %626 }
 0x5f5   :  { %382 = vrot.lane.b32.xlu0 %v627_v9, %s638_s15 }
 0x667   :  { %v383_v11 = vpop.permute.xlu0 %382 }
 0x668   :  { %v385_v13 = vmul.f32 %v383_v11, %v380_v10 }
 0x66a   :  { %v387_v14 = vadd.f32 %v386_v12, %v385_v13 }
 0x66c   :  { %388 = vst.msk [vmem:[%s819_s8] sm:$0xff] %vm157_vm5, %v387_v14  ;;  %v389_v15 = vpack.c.bf16 %v387_v14, %v387_v14 }
 0x66e   :  { %402 = vrot.lane.b32.xlu1 %v389_v15, %s638_s15 }
 0x6e0   :  { %v403_v16 = vpop.permute.xlu1 %402 }
 0x6e1   :  { %587 = vmatmul.mubr.msk.bf16.vlgmr.msra.gmra.mrb[4].mxu0 %vm150_vm4, %v403_v16 }
 0x7b4   :  { %v453_v17 = vpop.f32.mrb[4].mxu0 }
 0x7b5   :  { %v454_v18 = vadd.f32 %v512_v2, %v453_v17  ;;  %v588_v19 = vpop.f32.mrb[5].mxu0 }
 0x7b6   :  { %v456_v20 = vpop.f32.mrb[6].mxu0 }
 0x7b7   :  { %459 = vmax.xlane.f32.xlu0 %v454_v18  ;;  %v589_v21 = vpop.f32.mrb[7].mxu0 }
 0x844   :  { %v460_v22 = vpop.xlane.xlu0 %459 }
 0x845   :  { %v461_v23 = vsub.f32 %v454_v18, %v460_v22 }
 0x847   :  { %v462_v24 = vmul.f32 1.442695, %v461_v23 }
 0x849   :  { %628 = vpow2.f32 %v462_v24 }
 0x853   :  { %v629_v25 = vpop.eup %628 }
 0x854   :  { %464 = vadd.xlane.f32.xlu1 %v629_v25 }
 0x8e1   :  { %v465_v26 = vpop.xlane.xlu1 %464 }
 0x8e2   :  { %630 = vlog2.f32 %v465_v26 }
 0x8ec   :  { %v631_v27 = vpop.eup %630 }
 0x8ed   :  { %v467_v28 = vmul.f32 0.6931472, %v631_v27 }
 0x8ef   :  { %v468_v29 = vsub.f32 %v461_v23, %v467_v28 }
 0x8f1   :  { %469 = vst [vmem:[%s824_s7] sm:$0xff] %v468_v29 }

</bundles_post_ra>
